<compile_context>
chip_gen: v7x
topology: tpu7x:2x2x1
jax: 0.10.0
libtpu: 0.0.40
codegen_flags: <defaults>
</compile_context>

<pallas_src>
import jax
import jax.numpy as jnp
from jax.experimental import pallas as pl
from jax.experimental.pallas import tpu as pltpu


def _round_up(x, m):
    return (x + m - 1) // m * m


# ----------------------------- kernels ---------------------------------------


def _adapter_kernel_self_residual(x_ref, w0t_ref, b0_ref, w1t_ref, b1_ref, out_ref):
    """Residual is x itself (identity=None path): single activation input stream."""
    x = x_ref[...]                                                    # (TILE_N, D)
    # ln1: x @ W0.T + b0  (W0 pre-transposed & lane-padded to (D, r_pad))
    h = jnp.dot(x, w0t_ref[...], preferred_element_type=jnp.float32) + b0_ref[...]
    # QuickGELU: h * sigmoid(1.702 * h)   (sigmoid -> EUP)
    h = h * jax.nn.sigmoid(1.702 * h)
    # Dropout(p=0) is the identity.
    h = h.astype(w1t_ref.dtype)
    # ln2: h @ W1.T + b1  (W1 pre-transposed to (r_pad, D); padded rows are zero -> exact)
    o = jnp.dot(h, w1t_ref[...], preferred_element_type=jnp.float32) + b1_ref[...]
    out_ref[...] = (x.astype(jnp.float32) + o).astype(out_ref.dtype)


def _adapter_kernel_explicit_residual(x_ref, w0t_ref, b0_ref, w1t_ref, b1_ref,
                                      id_ref, out_ref):
    """Residual is a user-supplied `identity` tensor (separate input stream)."""
    x = x_ref[...]
    h = jnp.dot(x, w0t_ref[...], preferred_element_type=jnp.float32) + b0_ref[...]
    h = h * jax.nn.sigmoid(1.702 * h)
    h = h.astype(w1t_ref.dtype)
    o = jnp.dot(h, w1t_ref[...], preferred_element_type=jnp.float32) + b1_ref[...]
    out_ref[...] = (id_ref[...].astype(jnp.float32) + o).astype(out_ref.dtype)


# ----------------------------- param prep (one-time, load time) ----------------


def prepare_adapter_params(w0, b0, w1, b1, *, lane=128):
    """Hoist transposes out of the hot path and zero-pad r to a lane multiple.

    w0: (r, D) ln1.weight   b0: (r,) ln1.bias
    w1: (D, r) ln2.weight   b1: (D,) ln2.bias
    Returns (w0t[D, r_pad], b0[1, r_pad], w1t[r_pad, D], b1[1, D]).

    Zero-padding the reduction dim is mathematically exact: padded columns of h are
    0 @ x + 0 = 0 and padded rows of w1t are zero, so they contribute nothing.
    """
    r, D = w0.shape
    r_pad = _round_up(r, lane)
    w0t = jnp.zeros((D, r_pad), w0.dtype).at[:, :r].set(w0.T)
    b0p = jnp.zeros((1, r_pad), b0.dtype).at[0, :r].set(b0)
    w1t = jnp.zeros((r_pad, D), w1.dtype).at[:r, :].set(w1.T)
    b1p = b1.reshape(1, -1)
    return w0t, b0p, w1t, b1p


# ----------------------------- hardware-aware sizing ---------------------------


def _tpu_vmem_capacity_bytes():
    try:
        info = pltpu.get_tpu_info()
        cap = getattr(info, "vmem_capacity_bytes", None)
        if isinstance(cap, int) and cap > 0:
            return cap
    except Exception:
        pass
    return 64 * 1024 * 1024          # conservative fallback (v7x physical VMEM per TC)


def _tpu_num_tensorcores():
    try:
        info = pltpu.get_tpu_info()
        for attr in ("num_cores", "num_tensorcores", "tensorcore_count",
                     "cores_per_chip", "num_cores_per_chip"):
            v = getattr(info, attr, None)
            if isinstance(v, int) and v > 0:
                return v
    except Exception:
        pass
    return 1


def _choose_tile_rows(N, D, r_pad, itemsize, n_act_streams, vmem_limit, max_tile_rows):
    """Pick the largest 8-aligned row tile whose double-buffered working set fits VMEM."""
    # Resident weights/biases (assume pipeline double-buffers them): conservative f32 sizing.
    weight_bytes = 2 * (2 * D * r_pad + r_pad + D) * 4
    budget = max(vmem_limit - weight_bytes - (2 << 20), 4 << 20)
    # Per-row footprint: double-buffered activation streams (x [, identity], out) plus the
    # f32 intermediates the kernel materializes (h, gelu(h), o / x_f32).
    per_row = n_act_streams * 2 * D * itemsize + (2 * r_pad + 3 * D) * 4
    tile = budget // per_row
    tile = min(tile, max_tile_rows)
    if N >= 8:
        tile = min(tile, (N // 8) * 8)   # never exceed the slab when avoidable
    tile = max(8, (tile // 8) * 8)
    return int(tile)


# ----------------------------- wrapper ----------------------------------------


def adapter_super_forward(x, w0t, b0_2d, w1t, b1_2d, identity=None,
                          *, max_tile_rows=32768):
    """
    x        : (B, S, D)
    w0t      : (D, r_pad)  pre-transposed, lane-padded ln1.weight
    b0_2d    : (1, r_pad)
    w1t      : (r_pad, D)  pre-transposed, lane-padded ln2.weight
    b1_2d    : (1, D)
    identity : optional (B, S, D); defaults to x (residual), in which case x is read only once.
    """
    B, S, D = x.shape
    r_pad = w0t.shape[1]
    N = B * S
    itemsize = jnp.dtype(x.dtype).itemsize

    x2 = x.reshape(N, D)
    id2 = None if identity is None else identity.reshape(N, D)
    n_act_streams = 2 if id2 is None else 3          # (x, out) or (x, identity, out)

    # Generation-aware VMEM budget: 0.75 * physical per-core VMEM (48 MiB v7x, 96 MiB v5e/v6e).
    vmem_cap = _tpu_vmem_capacity_bytes()
    vmem_limit = min((vmem_cap * 3) // 4, 100 * 1024 * 1024)

    TILE_N = _choose_tile_rows(N, D, r_pad, itemsize, n_act_streams,
                               vmem_limit, max_tile_rows)

    # Ragged N: last block is partial; Pallas masks its writeback (no jnp.pad, no out slice).
    grid = (pl.cdiv(N, TILE_N),)

    # Streaming activation tiles (double-buffered by Pallas).
    row_spec = pl.BlockSpec((TILE_N, D), lambda i: (i, 0))
    # Weights / biases: constant index_map -> DMA'd once, resident in VMEM for the row loop.
    # TODO(synk): once pipeline_mode=pl.Buffered(1) is verified on this jax/Mosaic build,
    # single-buffer these four specs to halve their (small) resident footprint.
    w0_spec = pl.BlockSpec((D, r_pad), lambda i: (0, 0))
    b0_spec = pl.BlockSpec((1, r_pad), lambda i: (0, 0))
    w1_spec = pl.BlockSpec((r_pad, D), lambda i: (0, 0))
    b1_spec = pl.BlockSpec((1, D), lambda i: (0, 0))

    wsize = jnp.dtype(w0t.dtype).itemsize
    cost = pl.CostEstimate(
        flops=4 * N * D * r_pad + 8 * N * r_pad + 2 * N * D,
        transcendentals=N * r_pad,                      # sigmoid in QuickGELU
        bytes_accessed=n_act_streams * N * D * itemsize
                       + (2 * D * r_pad + r_pad + D) * wsize,
    )

    # Row tiles are independent: shard across TensorCores when the chip has more than one
    # (v7x); fall back to the proven "parallel" string on 1-TC parts (no codegen change).
    num_cores = _tpu_num_tensorcores()
    if num_cores > 1 and grid[0] >= num_cores:
        semantics = (getattr(pltpu, "CORE_PARALLEL", "parallel"),)
    else:
        semantics = ("parallel",)

    cparams = pltpu.CompilerParams(
        dimension_semantics=semantics,
        vmem_limit_bytes=int(vmem_limit),
    )

    out_shape = jax.ShapeDtypeStruct((N, D), x.dtype)

    if id2 is None:
        out2 = pl.pallas_call(
            _adapter_kernel_self_residual,
            out_shape=out_shape,
            grid=grid,
            in_specs=[row_spec, w0_spec, b0_spec, w1_spec, b1_spec],
            out_specs=row_spec,
            compiler_params=cparams,
            cost_estimate=cost,
        )(x2, w0t, b0_2d, w1t, b1_2d)
    else:
        out2 = pl.pallas_call(
            _adapter_kernel_explicit_residual,
            out_shape=out_shape,
            grid=grid,
            in_specs=[row_spec, w0_spec, b0_spec, w1_spec, b1_spec, row_spec],
            out_specs=row_spec,
            compiler_params=cparams,
            cost_estimate=cost,
        )(x2, w0t, b0_2d, w1t, b1_2d, id2)

    return out2.reshape(B, S, D)


# ----------------------------- reference & test --------------------------------


def _xavier_uniform(key, shape):
    # shape = (out_features, in_features), matches torch.nn.init.xavier_uniform_
    fan_out, fan_in = shape
    limit = jnp.sqrt(6.0 / (fan_in + fan_out))
    return jax.random.uniform(key, shape, jnp.float32, minval=-limit, maxval=limit)


def _reference(x, w0, b0, w1, b1, identity=None):
    if identity is None:
        identity = x
    h = x @ w0.T + b0
    h = h * jax.nn.sigmoid(1.702 * h)
    return identity + (h @ w1.T + b1)


if __name__ == "__main__":
    # Small shapes consistent with the module: embed_dims=32, reduction_dims=8.
    B, S, D, R = 2, 8, 32, 8

    key = jax.random.PRNGKey(0)
    kx, kw0, kb0, kw1, kb1, kid, kx2 = jax.random.split(key, 7)

    x = jax.random.normal(kx, (B, S, D), jnp.float32)

    # Deterministic parameter init mirroring AdapterSuper.init_weights():
    #   xavier_uniform_ on Linear weights, normal(std=1e-6) on biases.
    w0 = _xavier_uniform(kw0, (R, D))                       # ln1.weight
    b0 = 1e-6 * jax.random.normal(kb0, (R,), jnp.float32)   # ln1.bias
    w1 = _xavier_uniform(kw1, (D, R))                       # ln2.weight
    b1 = 1e-6 * jax.random.normal(kb1, (D,), jnp.float32)   # ln2.bias

    # One-time (load-time) transpose + lane-pad of the adapter params.
    w0t, b0_2d, w1t, b1_2d = prepare_adapter_params(w0, b0, w1, b1)

    # --- default residual path (identity=None): single activation stream ---
    out = adapter_super_forward(x, w0t, b0_2d, w1t, b1_2d)
    jax.block_until_ready(out)
    ref = _reference(x, w0, b0, w1, b1)
    assert jnp.allclose(out, ref, atol=1e-5, rtol=1e-5), "mismatch vs reference (self residual)"

    # --- explicit identity + ragged row count (exercises the masked partial-tile path) ---
    x_r = jax.random.normal(kx2, (B, S + 1, D), jnp.float32)          # N = 18, not tile-aligned
    ident = jax.random.normal(kid, (B, S + 1, D), jnp.float32)
    out_r = adapter_super_forward(x_r, w0t, b0_2d, w1t, b1_2d, identity=ident)
    jax.block_until_ready(out_r)
    ref_r = _reference(x_r, w0, b0, w1, b1, identity=ident)
    assert jnp.allclose(out_r, ref_r, atol=1e-5, rtol=1e-5), "mismatch vs reference (explicit identity)"

    print("KERNEL_OK")
</pallas_src>

<mosaic_0001>
module attributes {stable_mosaic.version = 11 : i64} {
  func.func @_adapter_kernel_self_residual(%arg0: i32, %arg1: memref<16x32xf32, #tpu.memory_space<vmem>>, %arg2: memref<32x128xf32, #tpu.memory_space<vmem>>, %arg3: memref<1x128xf32, #tpu.memory_space<vmem>>, %arg4: memref<128x32xf32, #tpu.memory_space<vmem>>, %arg5: memref<1x32xf32, #tpu.memory_space<vmem>>, %arg6: memref<16x32xf32, #tpu.memory_space<vmem>>) attributes {dimension_semantics = [#tpu.dimension_semantics<parallel>], iteration_bounds = array<i64: 1>, scalar_prefetch = 0 : i64, scratch_operands = 0 : i64, tpu.core_type = #tpu.core_type<tc>, window_params = [{transform_indices = @transform_0, window_bounds = array<i64: 16, 32>}, {pipeline_mode = #tpu.pipeline_mode<synchronous>, transform_indices = @transform_1, window_bounds = array<i64: 32, 128>}, {pipeline_mode = #tpu.pipeline_mode<synchronous>, transform_indices = @transform_2, window_bounds = array<i64: 1, 128>}, {pipeline_mode = #tpu.pipeline_mode<synchronous>, transform_indices = @transform_3, window_bounds = array<i64: 128, 32>}, {pipeline_mode = #tpu.pipeline_mode<synchronous>, transform_indices = @transform_4, window_bounds = array<i64: 1, 32>}, {transform_indices = @transform_5, window_bounds = array<i64: 16, 32>}]} {
    %c0 = arith.constant 0 : index
    %c0_0 = arith.constant 0 : index
    %0 = vector.load %arg1[%c0, %c0_0] : memref<16x32xf32, #tpu.memory_space<vmem>>, vector<16x32xf32>
    %c0_1 = arith.constant 0 : index
    %c0_2 = arith.constant 0 : index
    %1 = vector.load %arg2[%c0_1, %c0_2] : memref<32x128xf32, #tpu.memory_space<vmem>>, vector<32x128xf32>
    %cst = arith.constant dense<0.000000e+00> : vector<16x128xf32>
    %2 = tpu.matmul %0, %1, %cst {dimension_numbers = #tpu.dot_dimension_numbers<[1], [0], [0], [1], [0, 0, 1, 1], [], []>} : vector<16x32xf32>, vector<32x128xf32>, vector<16x128xf32> -> vector<16x128xf32>
    %c0_3 = arith.constant 0 : index
    %c0_4 = arith.constant 0 : index
    %3 = vector.load %arg3[%c0_3, %c0_4] : memref<1x128xf32, #tpu.memory_space<vmem>>, vector<1x128xf32>
    %4 = vector.broadcast %3 : vector<1x128xf32> to vector<16x128xf32>
    %5 = arith.addf %2, %4 : vector<16x128xf32>
    %cst_5 = arith.constant 1.702000e+00 : f32
    %6 = vector.broadcast %cst_5 : f32 to vector<16x128xf32>
    %7 = arith.mulf %6, %5 : vector<16x128xf32>
    %8 = arith.negf %7 : vector<16x128xf32>
    %9 = math.exp %8 : vector<16x128xf32>
    %cst_6 = arith.constant 1.000000e+00 : f32
    %10 = vector.broadcast %cst_6 : f32 to vector<16x128xf32>
    %11 = arith.addf %10, %9 : vector<16x128xf32>
    %12 = arith.divf %10, %11 : vector<16x128xf32>
    %13 = arith.mulf %5, %12 : vector<16x128xf32>
    %c0_7 = arith.constant 0 : index
    %c0_8 = arith.constant 0 : index
    %14 = vector.load %arg4[%c0_7, %c0_8] : memref<128x32xf32, #tpu.memory_space<vmem>>, vector<128x32xf32>
    %cst_9 = arith.constant dense<0.000000e+00> : vector<16x32xf32>
    %15 = tpu.matmul %13, %14, %cst_9 {dimension_numbers = #tpu.dot_dimension_numbers<[1], [0], [0], [1], [0, 0, 1, 1], [], []>} : vector<16x128xf32>, vector<128x32xf32>, vector<16x32xf32> -> vector<16x32xf32>
    %c0_10 = arith.constant 0 : index
    %c0_11 = arith.constant 0 : index
    %16 = vector.load %arg5[%c0_10, %c0_11] : memref<1x32xf32, #tpu.memory_space<vmem>>, vector<1x32xf32>
    %17 = vector.broadcast %16 : vector<1x32xf32> to vector<16x32xf32>
    %18 = arith.addf %15, %17 : vector<16x32xf32>
    %19 = arith.addf %0, %18 : vector<16x32xf32>
    %c0_12 = arith.constant 0 : index
    %c0_13 = arith.constant 0 : index
    %20 = vector.load %arg6[%c0_12, %c0_13] : memref<16x32xf32, #tpu.memory_space<vmem>>, vector<16x32xf32>
    tpu.vector_store %arg6[%c0_12, %c0_13], %19 {strides = array<i32>} : memref<16x32xf32, #tpu.memory_space<vmem>>, vector<16x32xf32>,
    return
  }
  func.func @transform_0(%arg0: i32) -> (i32, i32) {
    %c0_i32 = arith.constant 0 : i32
    %c0_i32_0 = arith.constant 0 : i32
    return %arg0, %c0_i32 : i32, i32
  }
  func.func @transform_1(%arg0: i32) -> (i32, i32) {
    %c0_i32 = arith.constant 0 : i32
    %c0_i32_0 = arith.constant 0 : i32
    %c0_i32_1 = arith.constant 0 : i32
    return %c0_i32, %c0_i32_0 : i32, i32
  }
  func.func @transform_2(%arg0: i32) -> (i32, i32) {
    %c0_i32 = arith.constant 0 : i32
    %c0_i32_0 = arith.constant 0 : i32
    %c0_i32_1 = arith.constant 0 : i32
    return %c0_i32, %c0_i32_0 : i32, i32
  }
  func.func @transform_3(%arg0: i32) -> (i32, i32) {
    %c0_i32 = arith.constant 0 : i32
    %c0_i32_0 = arith.constant 0 : i32
    %c0_i32_1 = arith.constant 0 : i32
    return %c0_i32, %c0_i32_0 : i32, i32
  }
  func.func @transform_4(%arg0: i32) -> (i32, i32) {
    %c0_i32 = arith.constant 0 : i32
    %c0_i32_0 = arith.constant 0 : i32
    %c0_i32_1 = arith.constant 0 : i32
    return %c0_i32, %c0_i32_0 : i32, i32
  }
  func.func @transform_5(%arg0: i32) -> (i32, i32) {
    %c0_i32 = arith.constant 0 : i32
    %c0_i32_0 = arith.constant 0 : i32
    return %arg0, %c0_i32 : i32, i32
  }
}

</mosaic_0001>

<bundles_post_ra>
// kernel: tpu_custom_call.1
= control target key start
LH: loop header
LB: loop body
LE: loop exit
PB: predicated region body
PF: predicated region fallthrough
CT: control target
= control target key end

     0   :  { %vm34_vm0 = vcmask 261120   ;;  %s530_s0 = inlined_call_operand.vmem [shape: f32[16,32], index: 0, kind: input, shape index: {}]   ;;  %s531_s1 = inlined_call_operand.vmem [shape: f32[32,128], index: 1, kind: input, shape index: {}]   ;;  %s532_s2 = inlined_call_operand.vmem [shape: f32[1,128], index: 2, kind: input, shape index: {}]   ;;  %s533_s3 = inlined_call_operand.vmem [shape: f32[128,32], index: 3, kind: input, shape index: {}]   ;;  %s534_s4 = inlined_call_operand.vmem [shape: f32[1,32], index: 4, kind: input, shape index: {}]   ;;  %s535_s5 = inlined_call_operand.hbm [shape: f32[16,32], index: 5, kind: output, shape index: {}]  }
   0x1   :  { %v23_v0 = vld [vmem:[%s531_s1] sm:$0xff]  ;;  %v24_v1 = vld [vmem:[%s531_s1 + $0x8] sm:$0xff]  ;;  %v25_v2 = vld [vmem:[%s531_s1 + $0x10] sm:$0xff] }
   0x2   :  { %v326_v3 = vpack.c.bf16 %v24_v1, %v23_v0  ;;  %v26_v4 = vld [vmem:[%s531_s1 + $0x18] sm:$0xff]  ;;  %v449_v5 = vld [vmem:[%s530_s0] sm:$0xff] }
   0x3   :  { %v330_v6 = vpack.c.bf16 %v26_v4, %v25_v2  ;;  %288 = vmatprep.mubr.msk.f32.mxu0 %vm34_vm0, %v449_v5 }
   0x4   :  { %10 = vsyncpa [#allocation3], 0  ;;  %327 = vmatprep.subr.bf16.mxu0 %v326_v3  ;;  %v456_v7 = vld [vmem:[%s530_s0 + $0x8] sm:$0xff]  ;;  %v132_v8 = vld [vmem:[%s533_s3] sm:$0xff]  ;;  %s401_s10 = smov [#allocation2]  }
   0x5   :  { %329 = vmatpush3.bf16.msra.mxu0 %v326_v3  ;;  %v133_v9 = vld [vmem:[%s533_s3 + $0x8] sm:$0xff]  ;;  %v134_v11 = vld [vmem:[%s533_s3 + $0x10] sm:$0xff]  ;;  %v135_v12 = vld [vmem:[%s533_s3 + $0x18] sm:$0xff]  ;;  %s239_s11 = sshll.u32 %s401_s10, 4  ;;  %s240_s11 = int_to_ptr.vmem [resolvable:$true] %s239_s11 }
   0x6   :  { %331 = vmatprep.subr.bf16.mxu0 %v330_v6  ;;  %v334_v10 = vpack.c.bf16 %v133_v9, %v132_v8  ;;  %v338_v13 = vpack.c.bf16 %v135_v12, %v134_v11  ;;  %v136_v14 = vld [vmem:[%s533_s3 + $0x20] sm:$0xff]  ;;  %v137_v15 = vld [vmem:[%s533_s3 + $0x28] sm:$0xff]  ;;  %v138_v17 = vld [vmem:[%s533_s3 + $0x30] sm:$0xff]  ;;  %s377_s12 = scalar_lea.vmem %s240_s11, 256  ;;  %p382_p1 = scmp.lt.s32.totalorder %s240_s11, %s240_s11 }
   0x7   :  { %v342_v16 = vpack.c.bf16 %v137_v15, %v136_v14  ;;  %v139_v18 = vld [vmem:[%s533_s3 + $0x38] sm:$0xff]  ;;  %v140_v20 = vld [vmem:[%s533_s3 + $0x40] sm:$0xff]  ;;  %v141_v21 = vld [vmem:[%s533_s3 + $0x48] sm:$0xff]  ;;  %p378_p0 = scmp.ne.s32.totalorder %s240_s11, %s377_s12  ;;  %p383_p2 = scmp.lt.s32.totalorder %s377_s12, %s377_s12 }
   0x8   :  { %335 = vmatprep.subr.bf16.mxu1 %v334_v10  ;;  %v346_v19 = vpack.c.bf16 %v139_v18, %v138_v17  ;;  %v350_v22 = vpack.c.bf16 %v141_v21, %v140_v20  ;;  %v142_v23 = vld [vmem:[%s533_s3 + $0x50] sm:$0xff]  ;;  %v143_v24 = vld [vmem:[%s533_s3 + $0x58] sm:$0xff]  ;;  %v144_v26 = vld [vmem:[%s533_s3 + $0x60] sm:$0xff] }
   0x9   :  { %333 = vmatpush3.bf16.msra.mxu0 %v330_v6  ;;  %337 = vmatpush3.bf16.msra.mxu1 %v334_v10  ;;  %v354_v25 = vpack.c.bf16 %v143_v24, %v142_v23  ;;  %v145_v27 = vld [vmem:[%s533_s3 + $0x68] sm:$0xff]  ;;  %v146_v29 = vld [vmem:[%s533_s3 + $0x70] sm:$0xff]  ;;  %v147_v30 = vld [vmem:[%s533_s3 + $0x78] sm:$0xff]  ;;  %p384_p3 = por %p383_p2, %p382_p1 }
   0xa   :  { %339 = vmatprep.subr.bf16.mxu1 %v338_v13  ;;  %v358_v28 = vpack.c.bf16 %v145_v27, %v144_v26  ;;  %v362_v31 = vpack.c.bf16 %v147_v30, %v146_v29  ;;  %v250_v32 = vld [vmem:[%s532_s2] ss:$0 sm:$0xff] }
   0xb   :  { %v255_v49 = vld [vmem:[%s534_s4] ss:$0 sm:$0xff]  ;;  %p385_p4 = pnand %p384_p3, %p378_p0 }
   0xc   :  { %289 = vmatmul.mubr.msk.f32.vlgmr.msra.gmra.mrb[0].mxu0 %vm34_vm0, %v456_v7 }
   0xd   :  { %341 = vmatpush3.bf16.msra.mxu1 %v338_v13 }
   0xe   :  { %343 = vmatprep.subr.bf16.mxu1 %v342_v16 }
  0x11   :  { %345 = vmatpush3.bf16.msra.mxu1 %v342_v16 }
  0x12   :  { %347 = vmatprep.subr.bf16.mxu1 %v346_v19 }
  0x15   :  { %349 = vmatpush3.bf16.msra.mxu1 %v346_v19 }
  0x16   :  { %351 = vmatprep.subr.bf16.mxu1 %v350_v22 }
  0x19   :  { %353 = vmatpush3.bf16.msra.mxu1 %v350_v22 }
  0x1a   :  { %355 = vmatprep.subr.bf16.mxu1 %v354_v25 }
  0x1d   :  { %357 = vmatpush3.bf16.msra.mxu1 %v354_v25 }
  0x1e   :  { %359 = vmatprep.subr.bf16.mxu1 %v358_v28 }
  0x21   :  { %361 = vmatpush3.bf16.msra.mxu1 %v358_v28 }
  0x22   :  { %363 = vmatprep.subr.bf16.mxu1 %v362_v31 }
  0x25   :  { %365 = vmatpush3.bf16.msra.mxu1 %v362_v31 }
  0xdf   :  { %v290_v33 = vpop.f32.mrb[0].mxu0 }
  0xe0   :  { %v113_v34 = vadd.f32 %v290_v33, %v250_v32  ;;  %v107_v35 = vpop.f32.mrb[1].mxu0 }
  0xe1   :  { %v108_v36 = vadd.f32 %v250_v32, %v107_v35 }
  0xe2   :  { %v254_v37 = vmul.f32 -1.702, %v113_v34 }
  0xe3   :  { %v253_v38 = vmul.f32 -1.702, %v108_v36 }
  0xe4   :  { %v122_v39 = vmul.f32 1.442695, %v254_v37 }
  0xe5   :  { %v120_v40 = vmul.f32 1.442695, %v253_v38 }
  0xe6   :  { %369 = vpow2.f32 %v122_v39 }
  0xe7   :  { %371 = vpow2.f32 %v120_v40 }
  0xf0   :  { %v370_v41 = vpop.eup %369 }
  0xf1   :  { %v372_v42 = vpop.eup %371  ;;  %v125_v43 = vadd.f32 1.0, %v370_v41 }
  0xf2   :  { %v124_v44 = vadd.f32 1.0, %v372_v42 }
  0xf3   :  { %373 = vrcp.f32 %v125_v43 }
  0xf4   :  { %375 = vrcp.f32 %v124_v44 }
  0xfd   :  { %v374_v45 = vpop.eup %373 }
  0xfe   :  { %v376_v46 = vpop.eup %375  ;;  %v131_v48 = vmul.f32 %v374_v45, %v113_v34 }
  0xff   :  { %v130_v47 = vmul.f32 %v376_v46, %v108_v36 }
 0x101   :  { %323 = vmatprep.mubr.f32.mxu1 %v130_v47 }
 0x102   :  { %324 = vmatmul.mubr.f32.vlgmr.msra.gmra.mrb[0].mxu1 %v131_v48 }
 0x1d5   :  { %v325_v50 = vpop.f32.mrb[0].mxu1 }
 0x1d6   :  { %v227_v51 = vadd.f32 %v325_v50, %v255_v49  ;;  %v221_v52 = vpop.f32.mrb[1].mxu1 }
 0x1d7   :  { %v222_v53 = vadd.f32 %v255_v49, %v221_v52 }
 0x1d8   :  { %v231_v54 = vadd.f32 %v227_v51, %v456_v7 }
 0x1d9   :  { %v230_v55 = vadd.f32 %v222_v53, %v449_v5 }
 0x1da   :  { %233 = vst.msk [vmem:[#allocation2 + $0x8] sm:$0xff] %vm34_vm0, %v231_v54 }
 0x1db   :  { %232 = vst.msk [vmem:[#allocation2] sm:$0xff] %vm34_vm0, %v230_v55 }
 0x1dc   :  { %388 = shalt.err (!%p385_p4)
}
 0x1dd   :  { %s389_s14 = scalar_lea.hbm %s535_s5, 256 }
 0x1de   :  { %p390_p5 = scmp.ne.s32.totalorder %s535_s5, %s389_s14  ;;  %p393_p6 = scmp.lt.u32.totalorder %s389_s14, %s535_s5 }
 0x1e0   :  { %p395_p7 = pnand %p393_p6, %p390_p5 }
 0x1e2   :  { %398 = shalt.err (!%p395_p7)
}
 0x1e3   :  { %s402_s19 = smov 128   ;;  %s403_s20 = smov 8  }
 0x1e4   :  { %245 = dma.vmem_to_hbm [thread:$0]  %s240_s11, 256, %s535_s5, [#allocation3], %s402_s19, %s402_s19, %s403_s20  }
 0x1e5   :  { %399 = dma.done.wait [#allocation3], 256  }
 0x1e6   :  { %400 = vsyncadd [#allocation3], 4294967040 }
 0x1e7   :  { %249 = vsyncpa [#allocation3], 1 }

</bundles_post_ra>
